<compile_context>
chip_gen: v7x
topology: tpu7x:2x2x1
jax: 0.10.0
libtpu: 0.0.40
codegen_flags: <defaults>
</compile_context>

<pallas_src>
import functools

import jax
import jax.numpy as jnp
from jax import lax
from jax.experimental import pallas as pl
from jax.experimental.pallas import tpu as pltpu


# ----------------------------------------------------------------------------
# Generation-aware VMEM budgeting
# ----------------------------------------------------------------------------
def _detect_vmem_capacity_bytes():
    """Physical per-core VMEM (128 MiB on v5e/v6e, 64 MiB on v7x)."""
    try:
        cap = int(getattr(pltpu.get_tpu_info(), "vmem_capacity_bytes", 0))
        if cap > 0:
            return cap
    except Exception:
        pass
    return 64 * 1024 * 1024           # conservative default (v7x per-TensorCore)


_VMEM_CAP_BYTES = _detect_vmem_capacity_bytes()
# Scoped-VMEM limit for Mosaic: ~41 MiB on v7x (64 MiB physical), ~83 MiB on
# v5e/v6e (128 MiB physical) — leaves headroom for compiler-internal scratch.
_VMEM_LIMIT_BYTES = min(int(_VMEM_CAP_BYTES * 0.65), 88 * 1024 * 1024)
# Budget for pipeline-buffered tiles (rest of the limit is slack).
_BUFFER_BUDGET_BYTES = int(_VMEM_LIMIT_BYTES * 0.85)


def _compiler_params(dimension_semantics):
    return pltpu.CompilerParams(dimension_semantics=dimension_semantics,
                                vmem_limit_bytes=_VMEM_LIMIT_BYTES)


# ----------------------------------------------------------------------------
# Fused path: stats + normalize on a VMEM-resident (N, cg, L) channel-group
# block.  HBM traffic: 1 read + 1 write of x.
# ----------------------------------------------------------------------------
def _fused_bn_kernel(x_ref, w_ref, b_ref, o_ref, mean_ref, var_ref, *,
                     inv_count, eps):
    # x_ref: (N, cg, L) block; w/b/mean/var refs: (1, cg, 1).
    # NOTE: for a ragged last channel group, padded channel rows hold garbage;
    # every reduction below is strictly per-channel (over N and L only), so the
    # garbage never mixes with real channels and the padded outputs are dropped
    # on writeback by Pallas.
    n_batch = x_ref.shape[0]
    cg = x_ref.shape[1]

    # sweep 1: per-channel sum over (N, L)  ->  mean
    def sum_body(i, acc):
        xi = x_ref[i].astype(jnp.float32)                     # (cg, L)
        return acc + jnp.sum(xi, axis=1, keepdims=True)        # (cg, 1)

    s = lax.fori_loop(0, n_batch, sum_body,
                      jnp.zeros((cg, 1), jnp.float32))
    mean = s * inv_count                                        # (cg, 1)

    # sweep 2: mean-centered variance (numerically safer than E[x^2]-E[x]^2);
    # the block is already VMEM-resident so this extra sweep costs no HBM.
    def var_body(i, acc):
        d = x_ref[i].astype(jnp.float32) - mean
        return acc + jnp.sum(d * d, axis=1, keepdims=True)

    v = lax.fori_loop(0, n_batch, var_body,
                      jnp.zeros((cg, 1), jnp.float32))
    var = v * inv_count                                         # biased variance

    scale = w_ref[0] * lax.rsqrt(var + eps)                     # (cg, 1)
    shift = b_ref[0] - mean * scale
    mean_ref[0] = mean
    var_ref[0] = var

    # sweep 3: normalize + writeback (folded affine: y = x*scale + shift)
    @pl.loop(0, n_batch)
    def _(i):
        xi = x_ref[i].astype(jnp.float32)
        o_ref[i] = (xi * scale + shift).astype(o_ref.dtype)


def _pick_channel_group(n, c, l, itemsize, budget):
    """Channel-group size for the fused path, or None if it cannot fit VMEM.

    Group must be a multiple of 8 (or the full C) to satisfy the (8,128)
    block rule on the (cg, L) trailing dims.
    """
    per_channel = n * l
    if per_channel <= 0:
        return None
    # ~2x-buffered input + output blocks plus f32 per-slice temporaries.
    bytes_per_elem = 4 * itemsize + 4
    max_elems = budget // bytes_per_elem
    if c * per_channel <= max_elems:
        return c                                  # whole tensor in one block
    cg = (max_elems // per_channel) // 8 * 8
    if cg >= 8:
        return cg
    return None


def _fused_batch_norm(x_ncl, w32, b32, cg, *, eps, donate_input):
    n, c, l = x_ncl.shape
    w3 = w32.reshape(1, c, 1)
    b3 = b32.reshape(1, c, 1)
    n_groups = pl.cdiv(c, cg)
    kernel = functools.partial(_fused_bn_kernel,
                               inv_count=1.0 / float(n * l), eps=float(eps))
    y, mean3, var3 = pl.pallas_call(
        kernel,
        out_shape=(jax.ShapeDtypeStruct((n, c, l), x_ncl.dtype),
                   jax.ShapeDtypeStruct((1, c, 1), jnp.float32),
                   jax.ShapeDtypeStruct((1, c, 1), jnp.float32)),
        grid_spec=pltpu.PrefetchScalarGridSpec(
            num_scalar_prefetch=0,
            grid=(n_groups,),
            in_specs=[pl.BlockSpec((n, cg, l), lambda g: (0, g, 0)),
                      pl.BlockSpec((1, cg, 1), lambda g: (0, g, 0)),
                      pl.BlockSpec((1, cg, 1), lambda g: (0, g, 0))],
            out_specs=(pl.BlockSpec((n, cg, l), lambda g: (0, g, 0)),
                       pl.BlockSpec((1, cg, 1), lambda g: (0, g, 0)),
                       pl.BlockSpec((1, cg, 1), lambda g: (0, g, 0)))),
        # Only alias when the caller actually donates x at the jit boundary;
        # otherwise XLA would insert a defensive copy.
        input_output_aliases=({0: 0} if donate_input else {}),
        compiler_params=_compiler_params(("parallel",)),
    )(x_ncl, w3, b3)
    return y, mean3.reshape(c), var3.reshape(c)


# ----------------------------------------------------------------------------
# Streaming two-pass fallback (for tensors too large for the fused block).
# ----------------------------------------------------------------------------
def _pick_tiles(num_rows, row_len, bytes_per_elem, budget):
    """Pick (row_tile, col_tile) with row_tile*col_tile*bytes_per_elem <= budget.

    Prefers full-L (lane-dense) tiles; honors the (8,128) block rule.  For very
    large H*W it splits the lane axis instead of dropping below 8 rows.
    """
    max_elems = max(budget // bytes_per_elem, 8 * 128)
    rows = max_elems // row_len
    if rows >= num_rows:
        return num_rows, row_len                  # full extent is always legal
    if rows >= 8:
        return (rows // 8) * 8, row_len
    row_tile = num_rows if num_rows < 8 else 8
    col_tile = max(((max_elems // row_tile) // 128) * 128, 128)
    if col_tile >= row_len:
        return row_tile, row_len
    return row_tile, col_tile


def _row_stats_kernel(x_ref, stats_ref, *, total_l, col_tile, needs_mask):
    """Per-(n,c) row [sum, sumsq] accumulated over the (possibly split) L axis."""
    @pl.when(pl.program_id(1) == 0)
    def _():
        stats_ref[...] = jnp.zeros_like(stats_ref)

    x = x_ref[...].astype(jnp.float32)
    if needs_mask:  # ragged last L tile: zero out padded lanes before reducing
        col = (pl.program_id(1) * col_tile
               + lax.broadcasted_iota(jnp.int32, x.shape, 1))
        x = jnp.where(col < total_l, x, 0.0)
    # Merged output: one (row_tile, 2) writeback per tile instead of two.
    stats_ref[:, 0:1] += jnp.sum(x, axis=1, keepdims=True)
    stats_ref[:, 1:2] += jnp.sum(x * x, axis=1, keepdims=True)


def _scale_shift_kernel(x_ref, scale_ref, shift_ref, o_ref):
    x = x_ref[...].astype(jnp.float32)
    o_ref[...] = (x * scale_ref[...] + shift_ref[...]).astype(o_ref.dtype)


def _two_pass_batch_norm(x_rows, w32, b32, *, n, c, l, eps, donate_input):
    num_rows = n * c
    itemsize = jnp.dtype(x_rows.dtype).itemsize

    # --- pass 1: per-(n,c) row sums / sum-of-squares --------------------------
    # Pass 1 keeps only its double-buffered input tiles live, so it gets a
    # larger row tile than pass 2 (decoupled budgets).
    rt1, ct1 = _pick_tiles(num_rows, l, 2 * itemsize + 8, _BUFFER_BUDGET_BYTES)
    nr1, nc1 = pl.cdiv(num_rows, rt1), pl.cdiv(l, ct1)
    kernel1 = functools.partial(_row_stats_kernel, total_l=l, col_tile=ct1,
                                needs_mask=(nc1 > 1 and l % ct1 != 0))
    stats = pl.pallas_call(
        kernel1,
        out_shape=jax.ShapeDtypeStruct((num_rows, 2), jnp.float32),
        grid_spec=pltpu.PrefetchScalarGridSpec(
            num_scalar_prefetch=0,
            grid=(nr1, nc1),
            in_specs=[pl.BlockSpec((rt1, ct1), lambda i, j: (i, j))],
            out_specs=pl.BlockSpec((rt1, 2), lambda i, j: (i, 0))),
        compiler_params=_compiler_params(("parallel", "arbitrary")),
    )(x_rows)

    # --- tiny per-channel combine (C-sized arrays; negligible traffic) --------
    count = jnp.float32(n * l)
    st = stats.reshape(n, c, 2)
    mean = jnp.sum(st[..., 0], axis=0) / count
    # E[x^2]-E[x]^2 with >=0 clamp (can drift for ill-conditioned data; the
    # fused path uses a mean-centered variance instead).
    var = jnp.maximum(jnp.sum(st[..., 1], axis=0) / count - mean * mean, 0.0)
    scale_c = w32 * lax.rsqrt(var + eps)
    shift_c = b32 - mean * scale_c
    scale_rows = jnp.broadcast_to(scale_c[None, :], (n, c)).reshape(num_rows, 1)
    shift_rows = jnp.broadcast_to(shift_c[None, :], (n, c)).reshape(num_rows, 1)

    # --- pass 2: y = x * scale + shift -----------------------------------------
    rt2, ct2 = _pick_tiles(num_rows, l, 4 * itemsize + 8, _BUFFER_BUDGET_BYTES)
    nr2, nc2 = pl.cdiv(num_rows, rt2), pl.cdiv(l, ct2)
    y_rows = pl.pallas_call(
        _scale_shift_kernel,
        out_shape=jax.ShapeDtypeStruct((num_rows, l), x_rows.dtype),
        grid_spec=pltpu.PrefetchScalarGridSpec(
            num_scalar_prefetch=0,
            grid=(nr2, nc2),
            in_specs=[pl.BlockSpec((rt2, ct2), lambda i, j: (i, j)),
                      pl.BlockSpec((rt2, 1), lambda i, j: (i, 0)),
                      pl.BlockSpec((rt2, 1), lambda i, j: (i, 0))],
            out_specs=pl.BlockSpec((rt2, ct2), lambda i, j: (i, j))),
        input_output_aliases=({0: 0} if donate_input else {}),
        compiler_params=_compiler_params(("parallel", "parallel")),
    )(x_rows, scale_rows, shift_rows)
    return y_rows, mean, var


# ----------------------------------------------------------------------------
# Public forward
# ----------------------------------------------------------------------------
def csnorm_forward(x_nchw, weight_source, bias_source,
                   running_mean_source, running_var_source,
                   *, eps=1e-5, momentum=0.1,
                   donate_input=False, force_two_pass=False):
    """Forward of _CSNorm in training mode with source=True (NCHW input).

    Returns (z_nchw, new_running_mean_source, new_running_var_source).
    PyTorch's forward returns only z — the running stats are the in-place
    buffer side-effect, returned functionally here.
    """
    n, c, h, w = x_nchw.shape
    l = h * w
    itemsize = jnp.dtype(x_nchw.dtype).itemsize
    w32 = weight_source.astype(jnp.float32)
    b32 = bias_source.astype(jnp.float32)

    cg = None if force_two_pass else _pick_channel_group(
        n, c, l, itemsize, _BUFFER_BUDGET_BYTES)

    if cg is not None:
        # NCHW-native (N, C, L) view: metadata-only reshape, no HBM traffic.
        y_ncl, mean, var = _fused_batch_norm(
            x_nchw.reshape(n, c, l), w32, b32, cg,
            eps=eps, donate_input=donate_input)
        z_nchw = y_ncl.reshape(n, c, h, w)
    else:
        y_rows, mean, var = _two_pass_batch_norm(
            x_nchw.reshape(n * c, l), w32, b32,
            n=n, c=c, l=l, eps=eps, donate_input=donate_input)
        z_nchw = y_rows.reshape(n, c, h, w)

    # running-stat update (PyTorch uses the *unbiased* batch variance here)
    cnt = n * h * w
    unbiased_var = var * (cnt / max(cnt - 1, 1))
    new_rm = (1.0 - momentum) * running_mean_source.astype(jnp.float32) + momentum * mean
    new_rv = (1.0 - momentum) * running_var_source.astype(jnp.float32) + momentum * unbiased_var
    return z_nchw, new_rm, new_rv


def _reference_batch_norm(x_nchw, weight, bias, eps):
    """Pure-JAX reference mirroring F.batch_norm(training=True)."""
    mean = jnp.mean(x_nchw, axis=(0, 2, 3), keepdims=True)
    var = jnp.mean((x_nchw - mean) ** 2, axis=(0, 2, 3), keepdims=True)
    w = weight.reshape(1, -1, 1, 1)
    b = bias.reshape(1, -1, 1, 1)
    return (x_nchw - mean) * lax.rsqrt(var + eps) * w + b


if __name__ == "__main__":
    key = jax.random.PRNGKey(0)
    k_x, k_w = jax.random.split(key)

    N, C, H, W = 2, 4, 16, 16
    eps = 1e-5
    momentum = 0.1

    x = jax.random.normal(k_x, (N, C, H, W), dtype=jnp.float32) * 2.0 + 0.5

    # deterministic parameter init matching reset_parameters():
    #   weight_source ~ U[0,1), bias_source = 0, running_mean = 0, running_var = 1
    weight_source = jax.random.uniform(k_w, (C,), dtype=jnp.float32)
    bias_source = jnp.zeros((C,), dtype=jnp.float32)
    running_mean_source = jnp.zeros((C,), dtype=jnp.float32)
    running_var_source = jnp.ones((C,), dtype=jnp.float32)

    z_ref = _reference_batch_norm(x, weight_source, bias_source, eps)

    # primary fused (read-once) path — the one that runs for this shape
    fwd = jax.jit(functools.partial(csnorm_forward, eps=eps, momentum=momentum))
    z, new_rm, new_rv = fwd(x, weight_source, bias_source,
                            running_mean_source, running_var_source)
    z = jax.block_until_ready(z)
    assert z.shape == (N, C, H, W)
    assert jnp.max(jnp.abs(z - z_ref)) < 1e-4
    assert new_rm.shape == (C,) and new_rv.shape == (C,)

    # also exercise the streaming two-pass fallback used for very large tensors
    fwd2 = jax.jit(functools.partial(csnorm_forward, eps=eps, momentum=momentum,
                                     force_two_pass=True))
    z2, _, _ = fwd2(x, weight_source, bias_source,
                    running_mean_source, running_var_source)
    z2 = jax.block_until_ready(z2)
    assert jnp.max(jnp.abs(z2 - z_ref)) < 1e-4

    print("KERNEL_OK")
</pallas_src>

<mosaic_0001>
module attributes {stable_mosaic.version = 11 : i64} {
  func.func @_fused_bn_kernel(%arg0: i32, %arg1: memref<2x4x256xf32, #tpu.memory_space<vmem>>, %arg2: memref<1x4x1xf32, #tpu.memory_space<vmem>>, %arg3: memref<1x4x1xf32, #tpu.memory_space<vmem>>, %arg4: memref<2x4x256xf32, #tpu.memory_space<vmem>>, %arg5: memref<1x4x1xf32, #tpu.memory_space<vmem>>, %arg6: memref<1x4x1xf32, #tpu.memory_space<vmem>>) attributes {dimension_semantics = [#tpu.dimension_semantics<parallel>], iteration_bounds = array<i64: 1>, scalar_prefetch = 0 : i64, scratch_operands = 0 : i64, tpu.core_type = #tpu.core_type<tc>, window_params = [{transform_indices = @transform_0, window_bounds = array<i64: 2, 4, 256>}, {transform_indices = @transform_1, window_bounds = array<i64: 1, 4, 1>}, {transform_indices = @transform_2, window_bounds = array<i64: 1, 4, 1>}, {transform_indices = @transform_3, window_bounds = array<i64: 2, 4, 256>}, {transform_indices = @transform_4, window_bounds = array<i64: 1, 4, 1>}, {transform_indices = @transform_5, window_bounds = array<i64: 1, 4, 1>}]} {
    %cst = arith.constant 0.000000e+00 : f32
    %0 = vector.broadcast %cst : f32 to vector<4x1xf32>
    %c0_i32 = arith.constant 0 : i32
    %c2_i32 = arith.constant 2 : i32
    %1 = arith.addi %c0_i32, %c2_i32 : i32
    %c1_i32 = arith.constant 1 : i32
    %2 = scf.for %arg7 = %c0_i32 to %1 step %c1_i32 iter_args(%arg8 = %0) -> (vector<4x1xf32>)  : i32 {
      %27 = arith.index_cast %arg7 : i32 to index
      %c0_24 = arith.constant 0 : index
      %c0_25 = arith.constant 0 : index
      %28 = vector.load %arg1[%27, %c0_24, %c0_25] : memref<2x4x256xf32, #tpu.memory_space<vmem>>, vector<1x4x256xf32>
      %29 = vector.shape_cast %28 : vector<1x4x256xf32> to vector<4x256xf32>
      %cst_26 = arith.constant dense<0.000000e+00> : vector<4xf32>
      %30 = vector.multi_reduction <add>, %29, %cst_26 [1] : vector<4x256xf32> to vector<4xf32>
      %31 = vector.shape_cast %30 : vector<4xf32> to vector<4x1xf32>
      %32 = arith.addf %arg8, %31 : vector<4x1xf32>
      scf.yield %32 : vector<4x1xf32>
    }
    %c2_i32_0 = arith.constant 2 : i32
    %cst_1 = arith.constant 0.001953125 : f32
    %3 = vector.broadcast %cst_1 : f32 to vector<4x1xf32>
    %4 = arith.mulf %2, %3 : vector<4x1xf32>
    %cst_2 = arith.constant 0.000000e+00 : f32
    %5 = vector.broadcast %cst_2 : f32 to vector<4x1xf32>
    %c0_i32_3 = arith.constant 0 : i32
    %c2_i32_4 = arith.constant 2 : i32
    %6 = arith.addi %c0_i32_3, %c2_i32_4 : i32
    %c1_i32_5 = arith.constant 1 : i32
    %7 = scf.for %arg7 = %c0_i32_3 to %6 step %c1_i32_5 iter_args(%arg8 = %5) -> (vector<4x1xf32>)  : i32 {
      %27 = arith.index_cast %arg7 : i32 to index
      %c0_24 = arith.constant 0 : index
      %c0_25 = arith.constant 0 : index
      %28 = vector.load %arg1[%27, %c0_24, %c0_25] : memref<2x4x256xf32, #tpu.memory_space<vmem>>, vector<1x4x256xf32>
      %29 = vector.shape_cast %28 : vector<1x4x256xf32> to vector<4x256xf32>
      %30 = vector.broadcast %4 : vector<4x1xf32> to vector<4x256xf32>
      %31 = arith.subf %29, %30 : vector<4x256xf32>
      %32 = arith.mulf %31, %31 : vector<4x256xf32>
      %cst_26 = arith.constant dense<0.000000e+00> : vector<4xf32>
      %33 = vector.multi_reduction <add>, %32, %cst_26 [1] : vector<4x256xf32> to vector<4xf32>
      %34 = vector.shape_cast %33 : vector<4xf32> to vector<4x1xf32>
      %35 = arith.addf %arg8, %34 : vector<4x1xf32>
      scf.yield %35 : vector<4x1xf32>
    }
    %c2_i32_6 = arith.constant 2 : i32
    %cst_7 = arith.constant 0.001953125 : f32
    %8 = vector.broadcast %cst_7 : f32 to vector<4x1xf32>
    %9 = arith.mulf %7, %8 : vector<4x1xf32>
    %c0 = arith.constant 0 : index
    %c0_8 = arith.constant 0 : index
    %c0_9 = arith.constant 0 : index
    %10 = vector.load %arg2[%c0, %c0_8, %c0_9] : memref<1x4x1xf32, #tpu.memory_space<vmem>>, vector<1x4x1xf32>
    %11 = vector.shape_cast %10 : vector<1x4x1xf32> to vector<4x1xf32>
    %cst_10 = arith.constant 9.99999974E-6 : f32
    %12 = vector.broadcast %cst_10 : f32 to vector<4x1xf32>
    %13 = arith.addf %9, %12 : vector<4x1xf32>
    %14 = math.rsqrt %13 : vector<4x1xf32>
    %15 = arith.mulf %11, %14 : vector<4x1xf32>
    %c0_11 = arith.constant 0 : index
    %c0_12 = arith.constant 0 : index
    %c0_13 = arith.constant 0 : index
    %16 = vector.load %arg3[%c0_11, %c0_12, %c0_13] : memref<1x4x1xf32, #tpu.memory_space<vmem>>, vector<1x4x1xf32>
    %17 = vector.shape_cast %16 : vector<1x4x1xf32> to vector<4x1xf32>
    %18 = arith.mulf %4, %15 : vector<4x1xf32>
    %19 = arith.subf %17, %18 : vector<4x1xf32>
    %c0_14 = arith.constant 0 : index
    %c0_15 = arith.constant 0 : index
    %c0_16 = arith.constant 0 : index
    %20 = vector.load %arg5[%c0_14, %c0_15, %c0_16] : memref<1x4x1xf32, #tpu.memory_space<vmem>>, vector<1x4x1xf32>
    %21 = vector.shape_cast %20 : vector<1x4x1xf32> to vector<4x1xf32>
    %22 = vector.shape_cast %4 : vector<4x1xf32> to vector<1x4x1xf32>
    tpu.vector_store %arg5[%c0_14, %c0_15, %c0_16], %22 {strides = array<i32>} : memref<1x4x1xf32, #tpu.memory_space<vmem>>, vector<1x4x1xf32>,
    %c0_17 = arith.constant 0 : index
    %c0_18 = arith.constant 0 : index
    %c0_19 = arith.constant 0 : index
    %23 = vector.load %arg6[%c0_17, %c0_18, %c0_19] : memref<1x4x1xf32, #tpu.memory_space<vmem>>, vector<1x4x1xf32>
    %24 = vector.shape_cast %23 : vector<1x4x1xf32> to vector<4x1xf32>
    %25 = vector.shape_cast %9 : vector<4x1xf32> to vector<1x4x1xf32>
    tpu.vector_store %arg6[%c0_17, %c0_18, %c0_19], %25 {strides = array<i32>} : memref<1x4x1xf32, #tpu.memory_space<vmem>>, vector<1x4x1xf32>,
    %c0_i32_20 = arith.constant 0 : i32
    %c2_i32_21 = arith.constant 2 : i32
    %26 = arith.addi %c0_i32_20, %c2_i32_21 : i32
    %c1_i32_22 = arith.constant 1 : i32
    scf.for %arg7 = %c0_i32_20 to %26 step %c1_i32_22  : i32 {
      %c1_i32_24 = arith.constant 1 : i32
      %27 = arith.muli %arg7, %c1_i32_24 : i32
      %c0_i32_25 = arith.constant 0 : i32
      %28 = arith.addi %c0_i32_25, %27 : i32
      %29 = arith.index_cast %28 : i32 to index
      %c0_26 = arith.constant 0 : index
      %c0_27 = arith.constant 0 : index
      %30 = vector.load %arg1[%29, %c0_26, %c0_27] : memref<2x4x256xf32, #tpu.memory_space<vmem>>, vector<1x4x256xf32>
      %31 = vector.shape_cast %30 : vector<1x4x256xf32> to vector<4x256xf32>
      %32 = vector.broadcast %15 : vector<4x1xf32> to vector<4x256xf32>
      %33 = arith.mulf %31, %32 : vector<4x256xf32>
      %34 = vector.broadcast %19 : vector<4x1xf32> to vector<4x256xf32>
      %35 = arith.addf %33, %34 : vector<4x256xf32>
      %36 = arith.index_cast %28 : i32 to index
      %c0_28 = arith.constant 0 : index
      %c0_29 = arith.constant 0 : index
      %37 = vector.load %arg4[%36, %c0_28, %c0_29] : memref<2x4x256xf32, #tpu.memory_space<vmem>>, vector<1x4x256xf32>
      %38 = vector.shape_cast %37 : vector<1x4x256xf32> to vector<4x256xf32>
      %39 = vector.shape_cast %35 : vector<4x256xf32> to vector<1x4x256xf32>
      tpu.vector_store %arg4[%36, %c0_28, %c0_29], %39 {strides = array<i32>} : memref<2x4x256xf32, #tpu.memory_space<vmem>>, vector<1x4x256xf32>,
    }
    %c2_i32_23 = arith.constant 2 : i32
    return
  }
  func.func @transform_0(%arg0: i32) -> (i32, i32, i32) {
    %c0_i32 = arith.constant 0 : i32
    %c0_i32_0 = arith.constant 0 : i32
    %c0_i32_1 = arith.constant 0 : i32
    return %c0_i32, %arg0, %c0_i32_0 : i32, i32, i32
  }
  func.func @transform_1(%arg0: i32) -> (i32, i32, i32) {
    %c0_i32 = arith.constant 0 : i32
    %c0_i32_0 = arith.constant 0 : i32
    %c0_i32_1 = arith.constant 0 : i32
    return %c0_i32, %arg0, %c0_i32_0 : i32, i32, i32
  }
  func.func @transform_2(%arg0: i32) -> (i32, i32, i32) {
    %c0_i32 = arith.constant 0 : i32
    %c0_i32_0 = arith.constant 0 : i32
    %c0_i32_1 = arith.constant 0 : i32
    return %c0_i32, %arg0, %c0_i32_0 : i32, i32, i32
  }
  func.func @transform_3(%arg0: i32) -> (i32, i32, i32) {
    %c0_i32 = arith.constant 0 : i32
    %c0_i32_0 = arith.constant 0 : i32
    %c0_i32_1 = arith.constant 0 : i32
    return %c0_i32, %arg0, %c0_i32_0 : i32, i32, i32
  }
  func.func @transform_4(%arg0: i32) -> (i32, i32, i32) {
    %c0_i32 = arith.constant 0 : i32
    %c0_i32_0 = arith.constant 0 : i32
    %c0_i32_1 = arith.constant 0 : i32
    return %c0_i32, %arg0, %c0_i32_0 : i32, i32, i32
  }
  func.func @transform_5(%arg0: i32) -> (i32, i32, i32) {
    %c0_i32 = arith.constant 0 : i32
    %c0_i32_0 = arith.constant 0 : i32
    %c0_i32_1 = arith.constant 0 : i32
    return %c0_i32, %arg0, %c0_i32_0 : i32, i32, i32
  }
}

</mosaic_0001>

<bundles_post_ra>
// kernel: csnorm_forward.1
= control target key start
LH: loop header
LB: loop body
LE: loop exit
PB: predicated region body
PF: predicated region fallthrough
CT: control target
= control target key end

     0   :  { %v239_v0 = vmov 0.0   ;;  %s243_s18 = smov 0   ;;  %s324_s0 = inlined_call_operand.vmem [shape: f32[2,4,256], index: 0, kind: input, shape index: {}]   ;;  %s325_s1 = inlined_call_operand.vmem [shape: f32[1,4,1], index: 1, kind: input, shape index: {}]   ;;  %s326_s2 = inlined_call_operand.vmem [shape: f32[1,4,1], index: 2, kind: input, shape index: {}]   ;;  %s327_s3 = inlined_call_operand.vmem [shape: f32[2,4,256], index: 3, kind: output, shape index: {0}]   ;;  %s328_s4 = inlined_call_operand.vmem [shape: f32[1,4,1], index: 4, kind: output, shape index: {1}]   ;;  %s329_s5 = inlined_call_operand.vmem [shape: f32[1,4,1], index: 5, kind: output, shape index: {2}]  }
   0x1 LB: > { %s169_s19 = sshll.u32 %s245_s18, 3  ;;  %vm31_vm0 = vcmask 1043456   ;;  %s22_s18 = sadd.s32 1, %s245_s18   ;;  %s245_s18 = sphi %s243_s18, %s22_s18   ;;  %v241_v0 = vphi %v239_v0, %v240_v0  }
   0x2   : > { %s26_s22 = scalar_lea.vmem %s324_s0, %s169_s19  ;;  %p19_p0 = scmp.ge.s32.totalorder %s22_s18, 2  }
   0x3   : > { %v27_v1 = vld [vmem:[%s26_s22] sm:$0xff]  ;;  %v247_v9 = vmov (%p19_p0), 0.0   ;;  %s296_s23 = smov (%p19_p0), 0  }
   0x4   : > { %v29_v2 = vcombine.high %v27_v1, %v27_v1  ;;  %v32_v3 = vsel %vm31_vm0, %v27_v1, 0.0 }
   0x6   : > { %v33_v4 = vsel %vm31_vm0, %v29_v2, 0.0 }
   0x7   : > { %v34_v5 = vadd.f32 %v33_v4, %v32_v3 }
   0x9   : > { %35 = vadd.xlane.f32.xlu0 %v34_v5 }
  0x93   :  { %21 = sbr.rel (!%p19_p0) target bundleno = 1 (0x1), region = 73 }
  0x96   : > { %v36_v6 = vpop.xlane.xlu0 %35 }
  0x97   : > { %v37_v7 = vadd.f32 %v241_v0, %v36_v6  }
  0x99   : > { %v240_v0 = vmov %v37_v7   ;;  %v38_v8 = vmul.f32 (%p19_p0), 0.001953125, %v37_v7 }
  0x9a LB: > { %v54_v10 = vlaneseq  ;;  %v259_v11 = vmov 839922192   ;;  %s170_s24 = sshll.u32 %s253_s23, 3  ;;  %s44_s23 = sadd.s32 1, %s253_s23   ;;  %s253_s23 = sphi %s296_s23, %s44_s23   ;;  %v249_v9 = vphi %v247_v9, %v248_v9  }
  0x9b   : > { %v52_v12 = vunpack.c.l.s4 %v259_v11  ;;  %s48_s27 = scalar_lea.vmem %s324_s0, %s170_s24  ;;  %p41_p1 = scmp.ge.s32.totalorder %s44_s23, 2  }
  0x9c   : > { %v55_v13 = vshrl.u32 %v54_v10, 7  ;;  %v49_v16 = vld [vmem:[%s48_s27] sm:$0xff]  ;;  %vm79_vm1 = vcmask (%p41_p1), 3072   ;;  %s255_s11 = smov (%p41_p1), 0  }
  0x9d   : > { %v53_v14 = vunpack.c.0.s8 %v52_v12  ;;  %80 = vst.msk [vmem:[%s328_s4] sm:$0xf] (%p41_p1), %vm79_vm1, %v38_v8  ;;  %v72_v28 = vld [vmem:[%s325_s1] sm:$0xf] (%p41_p1) }
  0x9e   :  { %v76_v31 = vld [vmem:[%s326_s2] sm:$0xf] (%p41_p1) }
  0x9f   : > { %v56_v15 = vsub.s32 %v53_v14, %v55_v13 }
  0xa1   : > { %v57_v17 = vrot.slane %v38_v8, %v56_v15 }
  0xa3   : > { %v59_v18 = vsub.f32 %v49_v16, %v57_v17 }
  0xa5   : > { %v60_v19 = vmul.f32 %v59_v18, %v59_v18 }
  0xa7   : > { %v62_v20 = vcombine.high %v60_v19, %v60_v19  ;;  %v65_v21 = vsel %vm31_vm0, %v60_v19, 0.0 }
  0xa9   : > { %v66_v22 = vsel %vm31_vm0, %v62_v20, 0.0 }
  0xaa   : > { %v67_v23 = vadd.f32 %v66_v22, %v65_v21 }
  0xac   : > { %68 = vadd.xlane.f32.xlu0 %v67_v23 }
 0x136   :  { %43 = sbr.rel (!%p41_p1) target bundleno = 154 (0x9a), region = 84 }
 0x139   : > { %v69_v24 = vpop.xlane.xlu0 %68 }
 0x13a   : > { %v70_v25 = vadd.f32 %v249_v9, %v69_v24  }
 0x13c   : > { %v248_v9 = vmov %v70_v25   ;;  %v71_v26 = vmul.f32 (%p41_p1), 0.001953125, %v70_v25 }
 0x13e   :  { %v73_v27 = vadd.f32 1e-05, %v71_v26  ;;  %81 = vst.msk [vmem:[%s329_s5] sm:$0xf] %vm79_vm1, %v71_v26 }
 0x140   :  { %216 = vrsqrt.f32 %v73_v27 }
 0x14a   :  { %v217_v29 = vpop.eup %216 }
 0x14b   :  { %v75_v30 = vmul.f32 %v217_v29, %v72_v28 }
 0x14d   :  { %v77_v32 = vmul.f32 %v75_v30, %v38_v8 }
 0x14f   :  { %v78_v33 = vsub.f32 %v76_v31, %v77_v32 }
 0x150 LB: > { %v260_v34 = vmov 0   ;;  %s171_s4 = sshll.u32 %s257_s11, 3  ;;  %s87_s11 = sadd.s32 1, %s257_s11   ;;  %s257_s11 = sphi %s255_s11, %s87_s11  }
 0x151   : > { %218 = vset.pattern.permute.xlu0 %v260_v34  ;;  %s90_s1 = scalar_lea.vmem %s324_s0, %s171_s4  ;;  %s119_s14 = scalar_lea.vmem %s327_s3, %s171_s4 }
 0x152   : > { %94 = vperm.xlu0 %218, %v75_v30   ;;  %v91_v37 = vld [vmem:[%s90_s1] sm:$0xff]  ;;  %p84_p2 = scmp.ge.s32.totalorder %s87_s11, 2  }
 0x156   : > { %107 = vperm.xlu0 %218, %v78_v33  }
 0x1d1   : > { %v95_v35 = vpop.permute.xlu0 %94 }
 0x1d2   : > { %v102_v36 = vrot.slane %v95_v35, %v56_v15 }
 0x1d4   : > { %v104_v39 = vmul.f32 %v102_v36, %v91_v37  ;;  %86 = sbr.rel (!%p84_p2) target bundleno = 336 (0x150), region = 95 }
 0x1d5   : > { %v108_v38 = vpop.permute.xlu0 %107 }
 0x1d6   : > { %v115_v40 = vrot.slane %v108_v38, %v56_v15 }
 0x1d8   : > { %v117_v41 = vadd.f32 %v115_v40, %v104_v39 }
 0x1da   : > { %120 = vst [vmem:[%s119_s14] sm:$0xff] %v117_v41 }

</bundles_post_ra>
